<compile_context>
chip_gen: v6e
topology: v6e:2x2x1
jax: 0.10.0
libtpu: 0.0.40
codegen_flags: <defaults>
</compile_context>

<pallas_src>
import functools

import jax
import jax.numpy as jnp
from jax.experimental import pallas as pl
from jax.experimental.pallas import tpu as pltpu

LEAKY_SLOPE = 0.2
PAD = 128          # lane-dense width used for every padded weight block
NUM_LAYERS = 6     # e1, e2, head(mu|logvar), d1, d2, out


# ----------------------------------------------------------------------------- kernel
def _vae_kernel(x_ref, eps_ref, w_ref, c_ref, out_ref, *, d_in, latent):
    """Fused VAE forward over one (tb, .) batch tile.

    w_ref : (6, 128, 128) zero-padded weights (BN scale folded in, fused head).
    c_ref : (6, 1, 128)   zero-padded biases  (BN shift folded in).
    out_ref: (tb, 256)  = [ recon(0:d_in) | 0... | mean(128:128+L) | logvar(..+2L) | 0... ]
    """

    def dense(h, i, rows=None):
        # Linear (+ folded BatchNorm).  Padded weight rows/cols are zero, so
        # padded activation lanes contribute nothing.
        w = w_ref[i] if rows is None else w_ref[i, :rows, :]
        return jnp.dot(h, w, preferred_element_type=jnp.float32) + c_ref[i]

    def leaky(y):
        return jnp.where(y >= 0.0, y, LEAKY_SLOPE * y)

    # ---------------- encoder: [Linear+BN -> LeakyReLU -> Dropout(eval=id)] x 2
    h = leaky(dense(x_ref[...], 0, rows=d_in))        # (tb, 128)
    h = leaky(dense(h, 1))                            # (tb, 128)

    # ---------------- fused mean/logvar head: one matmul instead of two
    ml = dense(h, 2)                                  # lanes [0,L)=mean, [L,2L)=logvar
    mean = ml[:, :latent]
    logvar = ml[:, latent:2 * latent]

    # ---------------- reparameterize (binary) + straight-through threshold
    # sigmoid is monotone with sigmoid(0)=0.5, so (sigmoid(z) > 0.5) == (z > 0);
    # y_hard - y_soft.detach() + y_soft is forward-identical to y_hard.
    z = mean + eps_ref[...] * jnp.exp(0.5 * logvar)
    binary_z = (z > 0.0).astype(jnp.float32)          # (tb, latent)

    # ---------------- decoder
    d = leaky(dense(binary_z, 3, rows=latent))        # (tb, 128)
    d = leaky(dense(d, 4))                            # (tb, 128)
    logits = dense(d, 5)                              # (tb, 128), valid lanes [0,d_in)
    recon = pl.reciprocal(1.0 + jnp.exp(-logits))     # sigmoid (exact reciprocal)

    # single lane-dense (tb, 256) store; wrapper slices recon/mean/logvar out.
    out_ref[...] = jnp.concatenate([recon, ml], axis=-1)


# ----------------------------------------------------------------------------- wrapper
def pack_params(params, input_dim, hidden_dims, latent_dim):
    """Fold eval-mode BatchNorm into the Linear layers, fuse the mean/logvar
    head, and pack everything into two zero-padded slabs (2 DMAs vs 22)."""
    h1, h2 = hidden_dims
    assert max(input_dim, h1, h2, 2 * latent_dim) <= PAD

    def fold(w, b, s, t):
        # (x @ W + b) * s + t  ==  x @ (W * s) + (b * s + t)
        return w * s, b * s + t

    w_e1, c_e1 = fold(params["w_e1"], params["b_e1"], params["s_e1"], params["t_e1"])
    w_e2, c_e2 = fold(params["w_e2"], params["b_e2"], params["s_e2"], params["t_e2"])
    w_hd = jnp.concatenate([params["w_mu"], params["w_lv"]], axis=1)   # (h2, 2L)
    c_hd = jnp.concatenate([params["b_mu"], params["b_lv"]], axis=1)   # (1, 2L)
    w_d1, c_d1 = fold(params["w_d1"], params["b_d1"], params["s_d1"], params["t_d1"])
    w_d2, c_d2 = fold(params["w_d2"], params["b_d2"], params["s_d2"], params["t_d2"])
    w_o, c_o = params["w_out"], params["b_out"]

    weights = (w_e1, w_e2, w_hd, w_d1, w_d2, w_o)
    biases = (c_e1, c_e2, c_hd, c_d1, c_d2, c_o)

    w_slab = jnp.zeros((NUM_LAYERS, PAD, PAD), jnp.float32)
    c_slab = jnp.zeros((NUM_LAYERS, 1, PAD), jnp.float32)
    for i, (w, c) in enumerate(zip(weights, biases)):
        w_slab = w_slab.at[i, :w.shape[0], :w.shape[1]].set(w)
        c_slab = c_slab.at[i, :, :c.shape[1]].set(c)
    return w_slab, c_slab


def enhanced_vae_forward(x, eps, w_slab, c_slab, *, input_dim, latent_dim):
    B = x.shape[0]
    # Whole batch in one tile for small B; bounded tile for large B so the grid
    # has >1 parallel step (v7x megacore) and tiles stay well inside VMEM.
    tb = 512 if (B > 512 and B % 512 == 0) else B
    grid = (B // tb,)

    kernel = functools.partial(_vae_kernel, d_in=input_dim, latent=latent_dim)

    out = pl.pallas_call(
        kernel,
        grid=grid,
        in_specs=[
            pl.BlockSpec((tb, input_dim), lambda i: (i, 0)),           # x
            pl.BlockSpec((tb, latent_dim), lambda i: (i, 0)),          # eps
            pl.BlockSpec((NUM_LAYERS, PAD, PAD), lambda i: (0, 0, 0)),  # weight slab
            pl.BlockSpec((NUM_LAYERS, 1, PAD), lambda i: (0, 0, 0)),    # bias slab
        ],
        out_specs=pl.BlockSpec((tb, 2 * PAD), lambda i: (i, 0)),
        out_shape=jax.ShapeDtypeStruct((B, 2 * PAD), jnp.float32),
        compiler_params=pltpu.CompilerParams(
            dimension_semantics=("parallel",)),   # no cross-iteration carry
    )(x, eps, w_slab, c_slab)

    recon = out[:, :input_dim]
    mean = out[:, PAD:PAD + latent_dim]
    logvar = out[:, PAD + latent_dim:PAD + 2 * latent_dim]
    return recon, mean, logvar


# ----------------------------------------------------------------------------- params / reference
def init_params(key, input_dim, hidden_dims, latent_dim):
    h1, h2 = hidden_dims

    def lin(k, din, dout):
        kw, kb = jax.random.split(k)
        w = jax.random.normal(kw, (din, dout), jnp.float32) * (1.0 / jnp.sqrt(din))
        b = 0.05 * jax.random.normal(kb, (1, dout), jnp.float32)
        return w, b

    def bn(k, dim):
        kg, kb, km, kv = jax.random.split(k, 4)
        gamma = 1.0 + 0.1 * jax.random.normal(kg, (1, dim), jnp.float32)
        beta = 0.05 * jax.random.normal(kb, (1, dim), jnp.float32)
        rmean = 0.1 * jax.random.normal(km, (1, dim), jnp.float32)
        rvar = 1.0 + 0.1 * jax.random.uniform(kv, (1, dim), jnp.float32)
        scale = gamma / jnp.sqrt(rvar + 1e-5)   # eval-mode BN folded to scale/shift
        shift = beta - rmean * scale
        return scale, shift

    keys = jax.random.split(key, 11)
    p = {}
    p["w_e1"], p["b_e1"] = lin(keys[0], input_dim, h1)
    p["s_e1"], p["t_e1"] = bn(keys[1], h1)
    p["w_e2"], p["b_e2"] = lin(keys[2], h1, h2)
    p["s_e2"], p["t_e2"] = bn(keys[3], h2)
    p["w_mu"], p["b_mu"] = lin(keys[4], h2, latent_dim)
    p["w_lv"], p["b_lv"] = lin(keys[5], h2, latent_dim)
    p["w_d1"], p["b_d1"] = lin(keys[6], latent_dim, h2)
    p["s_d1"], p["t_d1"] = bn(keys[7], h2)
    p["w_d2"], p["b_d2"] = lin(keys[8], h2, h1)
    p["s_d2"], p["t_d2"] = bn(keys[9], h1)
    p["w_out"], p["b_out"] = lin(keys[10], h1, input_dim)
    return p


def vae_reference(x, eps, p):
    """Pure-JAX reference with the *original* (unfolded, un-simplified) math."""
    def block(h, w, b, s, t):
        y = h @ w + b
        y = y * s + t
        return jnp.where(y >= 0.0, y, LEAKY_SLOPE * y)

    h = block(x, p["w_e1"], p["b_e1"], p["s_e1"], p["t_e1"])
    h = block(h, p["w_e2"], p["b_e2"], p["s_e2"], p["t_e2"])
    mean = h @ p["w_mu"] + p["b_mu"]
    logvar = h @ p["w_lv"] + p["b_lv"]
    std = jnp.exp(0.5 * logvar)
    z = mean + eps * std
    y_soft = jax.nn.sigmoid(z)
    y_hard = (y_soft > 0.5).astype(jnp.float32)
    y = y_hard - y_soft + y_soft
    bz = (y > 0.5).astype(jnp.float32)
    d = block(bz, p["w_d1"], p["b_d1"], p["s_d1"], p["t_d1"])
    d = block(d, p["w_d2"], p["b_d2"], p["s_d2"], p["t_d2"])
    recon = jax.nn.sigmoid(d @ p["w_out"] + p["b_out"])
    return recon, mean, logvar


if __name__ == "__main__":
    B, INPUT_DIM, HIDDEN_DIMS, LATENT_DIM = 8, 16, (32, 24), 16

    key = jax.random.PRNGKey(0)
    kx, keps, kp = jax.random.split(key, 3)
    x = jax.random.uniform(kx, (B, INPUT_DIM), dtype=jnp.float32)
    eps = jax.random.normal(keps, (B, LATENT_DIM), dtype=jnp.float32)  # randn_like(std)
    params = init_params(kp, INPUT_DIM, HIDDEN_DIMS, LATENT_DIM)

    w_slab, c_slab = pack_params(params, INPUT_DIM, HIDDEN_DIMS, LATENT_DIM)
    recon, mean, logvar = enhanced_vae_forward(
        x, eps, w_slab, c_slab, input_dim=INPUT_DIM, latent_dim=LATENT_DIM)
    jax.block_until_ready((recon, mean, logvar))

    r_ref, m_ref, lv_ref = vae_reference(x, eps, params)
    assert recon.shape == (B, INPUT_DIM) and mean.shape == (B, LATENT_DIM)
    assert jnp.allclose(mean, m_ref, atol=1e-5), "mean mismatch"
    assert jnp.allclose(logvar, lv_ref, atol=1e-5), "logvar mismatch"
    assert jnp.allclose(recon, r_ref, atol=1e-5), "reconstruction mismatch"

    print("KERNEL_OK")
</pallas_src>

<mosaic_0001>
module attributes {stable_mosaic.version = 11 : i64} {
  func.func @_vae_kernel(%arg0: i32, %arg1: memref<8x16xf32, #tpu.memory_space<vmem>>, %arg2: memref<8x16xf32, #tpu.memory_space<vmem>>, %arg3: memref<6x128x128xf32, #tpu.memory_space<vmem>>, %arg4: memref<6x1x128xf32, #tpu.memory_space<vmem>>, %arg5: memref<8x256xf32, #tpu.memory_space<vmem>>) attributes {dimension_semantics = [#tpu.dimension_semantics<parallel>], iteration_bounds = array<i64: 1>, scalar_prefetch = 0 : i64, scratch_operands = 0 : i64, tpu.core_type = #tpu.core_type<tc>, window_params = [{transform_indices = @transform_0, window_bounds = array<i64: 8, 16>}, {transform_indices = @transform_1, window_bounds = array<i64: 8, 16>}, {pipeline_mode = #tpu.pipeline_mode<synchronous>, transform_indices = @transform_2, window_bounds = array<i64: 6, 128, 128>}, {pipeline_mode = #tpu.pipeline_mode<synchronous>, transform_indices = @transform_3, window_bounds = array<i64: 6, 1, 128>}, {transform_indices = @transform_4, window_bounds = array<i64: 8, 256>}]} {
    %c0 = arith.constant 0 : index
    %c0_0 = arith.constant 0 : index
    %0 = vector.load %arg1[%c0, %c0_0] : memref<8x16xf32, #tpu.memory_space<vmem>>, vector<8x16xf32>
    %c0_1 = arith.constant 0 : index
    %c0_2 = arith.constant 0 : index
    %c0_3 = arith.constant 0 : index
    %1 = vector.load %arg3[%c0_1, %c0_2, %c0_3] : memref<6x128x128xf32, #tpu.memory_space<vmem>>, vector<1x16x128xf32>
    %2 = vector.shape_cast %1 : vector<1x16x128xf32> to vector<16x128xf32>
    %cst = arith.constant dense<0.000000e+00> : vector<8x128xf32>
    %3 = tpu.matmul %0, %2, %cst {dimension_numbers = #tpu.dot_dimension_numbers<[1], [0], [0], [1], [0, 0, 1, 1], [], []>} : vector<8x16xf32>, vector<16x128xf32>, vector<8x128xf32> -> vector<8x128xf32>
    %c0_4 = arith.constant 0 : index
    %c0_5 = arith.constant 0 : index
    %c0_6 = arith.constant 0 : index
    %4 = vector.load %arg4[%c0_4, %c0_5, %c0_6] : memref<6x1x128xf32, #tpu.memory_space<vmem>>, vector<1x1x128xf32>
    %5 = vector.shape_cast %4 : vector<1x1x128xf32> to vector<1x128xf32>
    %6 = vector.broadcast %5 : vector<1x128xf32> to vector<8x128xf32>
    %7 = arith.addf %3, %6 : vector<8x128xf32>
    %cst_7 = arith.constant 0.000000e+00 : f32
    %8 = vector.broadcast %cst_7 : f32 to vector<8x128xf32>
    %9 = arith.cmpf oge, %7, %8 : vector<8x128xf32>
    %cst_8 = arith.constant 2.000000e-01 : f32
    %10 = vector.broadcast %cst_8 : f32 to vector<8x128xf32>
    %11 = arith.mulf %10, %7 : vector<8x128xf32>
    %12 = arith.select %9, %7, %11 : vector<8x128xi1>, vector<8x128xf32>
    %c1 = arith.constant 1 : index
    %c0_9 = arith.constant 0 : index
    %c0_10 = arith.constant 0 : index
    %13 = vector.load %arg3[%c1, %c0_9, %c0_10] : memref<6x128x128xf32, #tpu.memory_space<vmem>>, vector<1x128x128xf32>
    %14 = vector.shape_cast %13 : vector<1x128x128xf32> to vector<128x128xf32>
    %cst_11 = arith.constant dense<0.000000e+00> : vector<8x128xf32>
    %15 = tpu.matmul %12, %14, %cst_11 {dimension_numbers = #tpu.dot_dimension_numbers<[1], [0], [0], [1], [0, 0, 1, 1], [], []>} : vector<8x128xf32>, vector<128x128xf32>, vector<8x128xf32> -> vector<8x128xf32>
    %c1_12 = arith.constant 1 : index
    %c0_13 = arith.constant 0 : index
    %c0_14 = arith.constant 0 : index
    %16 = vector.load %arg4[%c1_12, %c0_13, %c0_14] : memref<6x1x128xf32, #tpu.memory_space<vmem>>, vector<1x1x128xf32>
    %17 = vector.shape_cast %16 : vector<1x1x128xf32> to vector<1x128xf32>
    %18 = vector.broadcast %17 : vector<1x128xf32> to vector<8x128xf32>
    %19 = arith.addf %15, %18 : vector<8x128xf32>
    %cst_15 = arith.constant 0.000000e+00 : f32
    %20 = vector.broadcast %cst_15 : f32 to vector<8x128xf32>
    %21 = arith.cmpf oge, %19, %20 : vector<8x128xf32>
    %cst_16 = arith.constant 2.000000e-01 : f32
    %22 = vector.broadcast %cst_16 : f32 to vector<8x128xf32>
    %23 = arith.mulf %22, %19 : vector<8x128xf32>
    %24 = arith.select %21, %19, %23 : vector<8x128xi1>, vector<8x128xf32>
    %c2 = arith.constant 2 : index
    %c0_17 = arith.constant 0 : index
    %c0_18 = arith.constant 0 : index
    %25 = vector.load %arg3[%c2, %c0_17, %c0_18] : memref<6x128x128xf32, #tpu.memory_space<vmem>>, vector<1x128x128xf32>
    %26 = vector.shape_cast %25 : vector<1x128x128xf32> to vector<128x128xf32>
    %cst_19 = arith.constant dense<0.000000e+00> : vector<8x128xf32>
    %27 = tpu.matmul %24, %26, %cst_19 {dimension_numbers = #tpu.dot_dimension_numbers<[1], [0], [0], [1], [0, 0, 1, 1], [], []>} : vector<8x128xf32>, vector<128x128xf32>, vector<8x128xf32> -> vector<8x128xf32>
    %c2_20 = arith.constant 2 : index
    %c0_21 = arith.constant 0 : index
    %c0_22 = arith.constant 0 : index
    %28 = vector.load %arg4[%c2_20, %c0_21, %c0_22] : memref<6x1x128xf32, #tpu.memory_space<vmem>>, vector<1x1x128xf32>
    %29 = vector.shape_cast %28 : vector<1x1x128xf32> to vector<1x128xf32>
    %30 = vector.broadcast %29 : vector<1x128xf32> to vector<8x128xf32>
    %31 = arith.addf %27, %30 : vector<8x128xf32>
    %32 = vector.extract_strided_slice %31 {offsets = [0, 0], sizes = [8, 16], strides = [1, 1]} : vector<8x128xf32> to vector<8x16xf32>
    %33 = vector.extract_strided_slice %31 {offsets = [0, 16], sizes = [8, 16], strides = [1, 1]} : vector<8x128xf32> to vector<8x16xf32>
    %c0_23 = arith.constant 0 : index
    %c0_24 = arith.constant 0 : index
    %34 = vector.load %arg2[%c0_23, %c0_24] : memref<8x16xf32, #tpu.memory_space<vmem>>, vector<8x16xf32>
    %cst_25 = arith.constant 5.000000e-01 : f32
    %35 = vector.broadcast %cst_25 : f32 to vector<8x16xf32>
    %36 = arith.mulf %35, %33 : vector<8x16xf32>
    %37 = math.exp %36 : vector<8x16xf32>
    %38 = arith.mulf %34, %37 : vector<8x16xf32>
    %39 = arith.addf %32, %38 : vector<8x16xf32>
    %cst_26 = arith.constant 0.000000e+00 : f32
    %40 = vector.broadcast %cst_26 : f32 to vector<8x16xf32>
    %41 = arith.cmpf ogt, %39, %40 : vector<8x16xf32>
    %42 = arith.extui %41 : vector<8x16xi1> to vector<8x16xi32>
    %43 = arith.sitofp %42 : vector<8x16xi32> to vector<8x16xf32>
    %c3 = arith.constant 3 : index
    %c0_27 = arith.constant 0 : index
    %c0_28 = arith.constant 0 : index
    %44 = vector.load %arg3[%c3, %c0_27, %c0_28] : memref<6x128x128xf32, #tpu.memory_space<vmem>>, vector<1x16x128xf32>
    %45 = vector.shape_cast %44 : vector<1x16x128xf32> to vector<16x128xf32>
    %cst_29 = arith.constant dense<0.000000e+00> : vector<8x128xf32>
    %46 = tpu.matmul %43, %45, %cst_29 {dimension_numbers = #tpu.dot_dimension_numbers<[1], [0], [0], [1], [0, 0, 1, 1], [], []>} : vector<8x16xf32>, vector<16x128xf32>, vector<8x128xf32> -> vector<8x128xf32>
    %c3_30 = arith.constant 3 : index
    %c0_31 = arith.constant 0 : index
    %c0_32 = arith.constant 0 : index
    %47 = vector.load %arg4[%c3_30, %c0_31, %c0_32] : memref<6x1x128xf32, #tpu.memory_space<vmem>>, vector<1x1x128xf32>
    %48 = vector.shape_cast %47 : vector<1x1x128xf32> to vector<1x128xf32>
    %49 = vector.broadcast %48 : vector<1x128xf32> to vector<8x128xf32>
    %50 = arith.addf %46, %49 : vector<8x128xf32>
    %cst_33 = arith.constant 0.000000e+00 : f32
    %51 = vector.broadcast %cst_33 : f32 to vector<8x128xf32>
    %52 = arith.cmpf oge, %50, %51 : vector<8x128xf32>
    %cst_34 = arith.constant 2.000000e-01 : f32
    %53 = vector.broadcast %cst_34 : f32 to vector<8x128xf32>
    %54 = arith.mulf %53, %50 : vector<8x128xf32>
    %55 = arith.select %52, %50, %54 : vector<8x128xi1>, vector<8x128xf32>
    %c4 = arith.constant 4 : index
    %c0_35 = arith.constant 0 : index
    %c0_36 = arith.constant 0 : index
    %56 = vector.load %arg3[%c4, %c0_35, %c0_36] : memref<6x128x128xf32, #tpu.memory_space<vmem>>, vector<1x128x128xf32>
    %57 = vector.shape_cast %56 : vector<1x128x128xf32> to vector<128x128xf32>
    %cst_37 = arith.constant dense<0.000000e+00> : vector<8x128xf32>
    %58 = tpu.matmul %55, %57, %cst_37 {dimension_numbers = #tpu.dot_dimension_numbers<[1], [0], [0], [1], [0, 0, 1, 1], [], []>} : vector<8x128xf32>, vector<128x128xf32>, vector<8x128xf32> -> vector<8x128xf32>
    %c4_38 = arith.constant 4 : index
    %c0_39 = arith.constant 0 : index
    %c0_40 = arith.constant 0 : index
    %59 = vector.load %arg4[%c4_38, %c0_39, %c0_40] : memref<6x1x128xf32, #tpu.memory_space<vmem>>, vector<1x1x128xf32>
    %60 = vector.shape_cast %59 : vector<1x1x128xf32> to vector<1x128xf32>
    %61 = vector.broadcast %60 : vector<1x128xf32> to vector<8x128xf32>
    %62 = arith.addf %58, %61 : vector<8x128xf32>
    %cst_41 = arith.constant 0.000000e+00 : f32
    %63 = vector.broadcast %cst_41 : f32 to vector<8x128xf32>
    %64 = arith.cmpf oge, %62, %63 : vector<8x128xf32>
    %cst_42 = arith.constant 2.000000e-01 : f32
    %65 = vector.broadcast %cst_42 : f32 to vector<8x128xf32>
    %66 = arith.mulf %65, %62 : vector<8x128xf32>
    %67 = arith.select %64, %62, %66 : vector<8x128xi1>, vector<8x128xf32>
    %c5 = arith.constant 5 : index
    %c0_43 = arith.constant 0 : index
    %c0_44 = arith.constant 0 : index
    %68 = vector.load %arg3[%c5, %c0_43, %c0_44] : memref<6x128x128xf32, #tpu.memory_space<vmem>>, vector<1x128x128xf32>
    %69 = vector.shape_cast %68 : vector<1x128x128xf32> to vector<128x128xf32>
    %cst_45 = arith.constant dense<0.000000e+00> : vector<8x128xf32>
    %70 = tpu.matmul %67, %69, %cst_45 {dimension_numbers = #tpu.dot_dimension_numbers<[1], [0], [0], [1], [0, 0, 1, 1], [], []>} : vector<8x128xf32>, vector<128x128xf32>, vector<8x128xf32> -> vector<8x128xf32>
    %c5_46 = arith.constant 5 : index
    %c0_47 = arith.constant 0 : index
    %c0_48 = arith.constant 0 : index
    %71 = vector.load %arg4[%c5_46, %c0_47, %c0_48] : memref<6x1x128xf32, #tpu.memory_space<vmem>>, vector<1x1x128xf32>
    %72 = vector.shape_cast %71 : vector<1x1x128xf32> to vector<1x128xf32>
    %73 = vector.broadcast %72 : vector<1x128xf32> to vector<8x128xf32>
    %74 = arith.addf %70, %73 : vector<8x128xf32>
    %cst_49 = arith.constant 0.000000e+00 : f32
    %75 = vector.broadcast %cst_49 : f32 to vector<8x128xf32>
    %76 = arith.subf %75, %74 : vector<8x128xf32>
    %77 = math.exp %76 : vector<8x128xf32>
    %cst_50 = arith.constant 1.000000e+00 : f32
    %78 = vector.broadcast %cst_50 : f32 to vector<8x128xf32>
    %79 = arith.addf %78, %77 : vector<8x128xf32>
    %80 = tpu.reciprocal %79 : vector<8x128xf32> -> vector<8x128xf32>
    %81 = tpu.concatenate %80, %31 in 1 : vector<8x128xf32>, vector<8x128xf32> -> vector<8x256xf32>
    %c0_51 = arith.constant 0 : index
    %c0_52 = arith.constant 0 : index
    %82 = vector.load %arg5[%c0_51, %c0_52] : memref<8x256xf32, #tpu.memory_space<vmem>>, vector<8x256xf32>
    tpu.vector_store %arg5[%c0_51, %c0_52], %81 {strides = array<i32>} : memref<8x256xf32, #tpu.memory_space<vmem>>, vector<8x256xf32>,
    return
  }
  func.func @transform_0(%arg0: i32) -> (i32, i32) {
    %c0_i32 = arith.constant 0 : i32
    %c0_i32_0 = arith.constant 0 : i32
    return %arg0, %c0_i32 : i32, i32
  }
  func.func @transform_1(%arg0: i32) -> (i32, i32) {
    %c0_i32 = arith.constant 0 : i32
    %c0_i32_0 = arith.constant 0 : i32
    return %arg0, %c0_i32 : i32, i32
  }
  func.func @transform_2(%arg0: i32) -> (i32, i32, i32) {
    %c0_i32 = arith.constant 0 : i32
    %c0_i32_0 = arith.constant 0 : i32
    %c0_i32_1 = arith.constant 0 : i32
    %c0_i32_2 = arith.constant 0 : i32
    return %c0_i32, %c0_i32_0, %c0_i32_1 : i32, i32, i32
  }
  func.func @transform_3(%arg0: i32) -> (i32, i32, i32) {
    %c0_i32 = arith.constant 0 : i32
    %c0_i32_0 = arith.constant 0 : i32
    %c0_i32_1 = arith.constant 0 : i32
    %c0_i32_2 = arith.constant 0 : i32
    return %c0_i32, %c0_i32_0, %c0_i32_1 : i32, i32, i32
  }
  func.func @transform_4(%arg0: i32) -> (i32, i32) {
    %c0_i32 = arith.constant 0 : i32
    %c0_i32_0 = arith.constant 0 : i32
    return %arg0, %c0_i32 : i32, i32
  }
}

</mosaic_0001>

<bundles_post_ra>
// kernel: tpu_custom_call.1
= control target key start
LH: loop header
LB: loop body
LE: loop exit
PB: predicated region body
PF: predicated region fallthrough
CT: control target
= control target key end

     0   :  { %9 = vsyncpa [#allocation3], 0  ;;  %s1164_s0 = inlined_call_operand.hbm [shape: f32[8,16], index: 0, kind: input, shape index: {}]   ;;  %s1165_s1 = inlined_call_operand.hbm [shape: f32[8,16], index: 1, kind: input, shape index: {}]   ;;  %s1166_s2 = inlined_call_operand.hbm [shape: f32[6,128,128], index: 2, kind: input, shape index: {}]   ;;  %s1167_s3 = inlined_call_operand.hbm [shape: f32[6,1,128], index: 3, kind: input, shape index: {}]   ;;  %s1168_s4 = inlined_call_operand.hbm [shape: f32[8,256], index: 4, kind: output, shape index: {}]  }
   0x1   :  { %10 = vsyncpa [#allocation6], 0 }
   0x2   :  { %11 = vsyncpa [#allocation9], 0 }
   0x3   :  { %12 = vsyncpa [#allocation4], 0  ;;  %s1029_s15 = smov [#allocation5]   ;;  %s1030_s17 = smov [#allocation2]  }
   0x4   :  { %s29_s16 = sshll.u32 %s1029_s15, 4  ;;  %s19_s18 = sshll.u32 %s1030_s17, 4  ;;  %s30_s16 = int_to_ptr.vmem [resolvable:$true] %s29_s16  ;;  %s20_s18 = int_to_ptr.vmem [resolvable:$true] %s19_s18 }
   0x5   :  { %s929_s19 = scalar_lea.vmem %s30_s16, 128  ;;  %p934_p1 = scmp.lt.s32.totalorder %s30_s16, %s30_s16 }
   0x6   :  { %p930_p0 = scmp.ne.s32.totalorder %s30_s16, %s929_s19  ;;  %p935_p2 = scmp.lt.s32.totalorder %s929_s19, %s929_s19 }
   0x8   :  { %p936_p3 = por %p935_p2, %p934_p1 }
   0xa   :  { %p937_p4 = pnand %p936_p3, %p930_p0 }
   0xc   :  { %940 = shalt.err (!%p937_p4)
}
   0xd   :  { %32 = dma.hbm_to_vmem [thread:$0]  %s1165_s1, 128, %s30_s16, [#allocation6]  }
   0xe   :  { %s949_s22 = scalar_lea.vmem %s20_s18, 128  ;;  %p954_p6 = scmp.lt.s32.totalorder %s20_s18, %s20_s18 }
   0xf   :  { %p950_p5 = scmp.ne.s32.totalorder %s20_s18, %s949_s22  ;;  %p955_p7 = scmp.lt.s32.totalorder %s949_s22, %s949_s22 }
  0x11   :  { %p956_p8 = por %p955_p7, %p954_p6 }
  0x13   :  { %p957_p9 = pnand %p956_p8, %p950_p5 }
  0x15   :  { %960 = shalt.err (!%p957_p9)
}
  0x16   :  { %22 = dma.hbm_to_vmem [thread:$0]  %s1164_s0, 128, %s20_s18, [#allocation3]  }
  0x17   :  { %s1031_s25 = smov [#allocation7]  }
  0x18   :  { %s38_s26 = sshll.u32 %s1031_s25, 4  ;;  %s39_s26 = int_to_ptr.vmem [resolvable:$true] %s38_s26 }
  0x19   :  { %s969_s27 = scalar_lea.vmem %s39_s26, 12288  ;;  %p974_p11 = scmp.lt.s32.totalorder %s39_s26, %s39_s26 }
  0x1a   :  { %p970_p10 = scmp.ne.s32.totalorder %s39_s26, %s969_s27  ;;  %p975_p12 = scmp.lt.s32.totalorder %s969_s27, %s969_s27 }
  0x1c   :  { %p976_p13 = por %p975_p12, %p974_p11 }
  0x1e   :  { %p977_p0 = pnand %p976_p13, %p970_p10 }
  0x20   :  { %980 = shalt.err (!%p977_p0)
}
  0x21   :  { %s1032_s1 = smov 128   ;;  %s1033_s28 = smov 8  }
  0x22   :  { %44 = dma.hbm_to_vmem [thread:$0]  %s1166_s2, 12288, %s39_s26, [#allocation6], %s1032_s1, %s1032_s1, %s1033_s28  }
  0x23   :  { %s1034_s5 = smov [#allocation8]  }
  0x24   :  { %s50_s6 = sshll.u32 %s1034_s5, 4  ;;  %s51_s6 = int_to_ptr.vmem [resolvable:$true] %s50_s6 }
  0x25   :  { %s989_s0 = scalar_lea.vmem %s51_s6, 96  ;;  %p994_p2 = scmp.lt.s32.totalorder %s51_s6, %s51_s6 }
  0x26   :  { %p990_p1 = scmp.ne.s32.totalorder %s51_s6, %s989_s0  ;;  %p995_p3 = scmp.lt.s32.totalorder %s989_s0, %s989_s0 }
  0x28   :  { %p996_p4 = por %p995_p3, %p994_p2 }
  0x2a   :  { %p997_p5 = pnand %p996_p4, %p990_p1 }
  0x2c   :  { %1000 = shalt.err (!%p997_p5)
}
  0x2d   :  { %s1035_s7 = smov 16   ;;  %s1036_s8 = smov 1  }
  0x2e   :  { %56 = dma.hbm_to_vmem [thread:$0]  %s1167_s3, 96, %s51_s6, [#allocation9], %s1035_s7, %s1035_s7, %s1036_s8  }
  0x2f   :  { %1021 = dma.done.wait [#allocation3], 128  }
  0x30   :  { %1022 = vsyncadd [#allocation3], 4294967168 }
  0x31   :  { %1023 = dma.done.wait [#allocation6], 12416  }
  0x32   :  { %1024 = vsyncadd [#allocation6], 4294954880 }
  0x33   :  { %1025 = dma.done.wait [#allocation9], 96  }
  0x34   :  { %1026 = vsyncadd [#allocation9], 4294967200  ;;  %v1037_v0 = vmov 0.0   ;;  %vm1038_vm0 = vmmov 0   ;;  %v71_v1 = vld [vmem:[#allocation7 + $0x8] sm:$0xff]  ;;  %v70_v2 = vld [vmem:[#allocation7] sm:$0xff] }
  0x35   :  { %749 = vmatprep.subr.mxu0 %v1037_v0  ;;  %753 = vmatprep.mubr.msk.f32.mxu0 %vm1038_vm0, %v1037_v0  ;;  %v69_v3 = vld [vmem:[#allocation2] sm:$0xff]  ;;  %vm79_vm1 = vcmask 130048   ;;  %v172_v4 = vld [vmem:[#allocation7 + $0xf8] sm:$0xff]  ;;  %v170_v6 = vld [vmem:[#allocation7 + $0xe8] sm:$0xff]  ;;  %s1039_s2 = smov 112   ;;  %s1040_s3 = smov [#allocation10]  }
  0x36   :  { %756 = vmatprep.subr.mxu1 %v1037_v0  ;;  %788 = vmatprep.mubr.msk.f32.mxu1 %vm1038_vm0, %v1037_v0  ;;  %v171_v5 = vld [vmem:[#allocation7 + $0xf0] sm:$0xff]  ;;  %v169_v7 = vld [vmem:[#allocation7 + $0xe0] sm:$0xff]  ;;  %v168_v8 = vld [vmem:[#allocation7 + $0xd8] sm:$0xff]  ;;  %s655_s11 = sshll.u32 %s1040_s3, 4  ;;  %s656_s11 = int_to_ptr.vmem [resolvable:$true] %s655_s11 }
  0x37   :  { %750 = vmatpush3.msra.mxu0 %v71_v1  ;;  %757 = vmatpush3.msra.mxu1 %v172_v4  ;;  %v167_v9 = vld [vmem:[#allocation7 + $0xd0] sm:$0xff]  ;;  %v166_v10 = vld [vmem:[#allocation7 + $0xc8] sm:$0xff]  ;;  %v165_v11 = vld [vmem:[#allocation7 + $0xc0] sm:$0xff]  ;;  %s1001_s12 = scalar_lea.vmem %s656_s11, 256  ;;  %p1006_p7 = scmp.lt.s32.totalorder %s656_s11, %s656_s11 }
  0x38   :  { %751 = vmatprep.subr.mxu0 %v1037_v0  ;;  %758 = vmatprep.subr.mxu1 %v1037_v0  ;;  %v164_v12 = vld [vmem:[#allocation7 + $0xb8] sm:$0xff]  ;;  %v163_v13 = vld [vmem:[#allocation7 + $0xb0] sm:$0xff]  ;;  %v162_v14 = vld [vmem:[#allocation7 + $0xa8] sm:$0xff]  ;;  %p1002_p6 = scmp.ne.s32.totalorder %s656_s11, %s1001_s12  ;;  %p1007_p8 = scmp.lt.s32.totalorder %s1001_s12, %s1001_s12 }
  0x39   :  { %752 = vmatpush3.msra.mxu0 %v70_v2  ;;  %759 = vmatpush3.msra.mxu1 %v171_v5  ;;  %v161_v15 = vld [vmem:[#allocation7 + $0xa0] sm:$0xff]  ;;  %v160_v16 = vld [vmem:[#allocation7 + $0x98] sm:$0xff]  ;;  %v159_v17 = vld [vmem:[#allocation7 + $0x90] sm:$0xff] }
  0x3a   :  { %754 = vmatmul.mubr.msk.f32.vlgmr.msra.gmra.mxu0 %vm79_vm1, %v69_v3  ;;  %760 = vmatprep.subr.mxu1 %v1037_v0  ;;  %v158_v18 = vld [vmem:[#allocation7 + $0x88] sm:$0xff]  ;;  %v157_v19 = vld [vmem:[#allocation7 + $0x80] sm:$0xff]  ;;  %v270_v20 = vld [vmem:[#allocation7 + $0x178] sm:$0xff]  ;;  %p1008_p9 = por %p1007_p8, %p1006_p7 }
  0x3b   :  { %791 = vmatprep.subr.mxu0 %v1037_v0  ;;  %761 = vmatpush3.msra.mxu1 %v170_v6  ;;  %v269_v21 = vld [vmem:[#allocation7 + $0x170] sm:$0xff]  ;;  %v268_v22 = vld [vmem:[#allocation7 + $0x168] sm:$0xff]  ;;  %v267_v23 = vld [vmem:[#allocation7 + $0x160] sm:$0xff] }
  0x3c   :  { %823 = vmatprep.mubr.msk.f32.mxu0 %vm1038_vm0, %v1037_v0  ;;  %762 = vmatprep.subr.mxu1 %v1037_v0  ;;  %v266_v24 = vld [vmem:[#allocation7 + $0x158] sm:$0xff]  ;;  %v265_v25 = vld [vmem:[#allocation7 + $0x150] sm:$0xff]  ;;  %v264_v26 = vld [vmem:[#allocation7 + $0x148] sm:$0xff]  ;;  %p1009_p10 = pnand %p1008_p9, %p1002_p6 }
  0x3d   :  { %763 = vmatpush3.msra.mxu1 %v169_v7  ;;  %792 = vmatpush3.msra.mxu0 %v270_v20  ;;  %v263_v27 = vld [vmem:[#allocation7 + $0x140] sm:$0xff]  ;;  %v262_v28 = vld [vmem:[#allocation7 + $0x138] sm:$0xff]  ;;  %v261_v29 = vld [vmem:[#allocation7 + $0x130] sm:$0xff] }
  0x3e   :  { %764 = vmatprep.subr.mxu1 %v1037_v0  ;;  %793 = vmatprep.subr.mxu0 %v1037_v0  ;;  %v260_v30 = vld [vmem:[#allocation7 + $0x128] sm:$0xff]  ;;  %v259_v31 = vld [vmem:[#allocation7 + $0x120] sm:$0xff]  ;;  %v258_v32 = vld [vmem:[#allocation7 + $0x118] sm:$0xff] }
  0x3f   :  { %765 = vmatpush3.msra.mxu1 %v168_v8  ;;  %794 = vmatpush3.msra.mxu0 %v269_v21  ;;  %v666_v33 = vld [vmem:[#allocation8] ss:$0 sm:$0xff]  ;;  %v257_v39 = vld [vmem:[#allocation7 + $0x110] sm:$0xff]  ;;  %v256_v40 = vld [vmem:[#allocation7 + $0x108] sm:$0xff] }
  0x40   :  { %766 = vmatprep.subr.mxu1 %v1037_v0  ;;  %795 = vmatprep.subr.mxu0 %v1037_v0  ;;  %v255_v41 = vld [vmem:[#allocation7 + $0x100] sm:$0xff]  ;;  %v364_v54 = vld [vmem:[#allocation7 + $0x188] sm:$0xff]  ;;  %v465_v56 = vld [vmem:[#allocation7 + $0x278] sm:$0xff] }
  0x41   :  { %767 = vmatpush3.msra.mxu1 %v167_v9  ;;  %796 = vmatpush3.msra.mxu0 %v268_v22  ;;  %v668_v42 = vld [vmem:[#allocation8 + $0x1] ss:$0 sm:$0xff]  ;;  %v669_v48 = vld [vmem:[#allocation8 + $0x2] ss:$0 sm:$0xff]  ;;  %v464_v57 = vld [vmem:[#allocation7 + $0x270] sm:$0xff] }
  0x42   :  { %768 = vmatprep.subr.mxu1 %v1037_v0  ;;  %797 = vmatprep.subr.mxu0 %v1037_v0  ;;  %v363_v55 = vld [vmem:[#allocation7 + $0x180] sm:$0xff]  ;;  %v463_v58 = vld [vmem:[#allocation7 + $0x268] sm:$0xff]  ;;  %v461_v61 = vld [vmem:[#allocation7 + $0x258] sm:$0xff] }
  0x43   :  { %769 = vmatpush3.msra.mxu1 %v166_v10  ;;  %798 = vmatpush3.msra.mxu0 %v267_v23  ;;  %v462_v59 = vld [vmem:[#allocation7 + $0x260] sm:$0xff]  ;;  %v460_v62 = vld [vmem:[#allocation7 + $0x250] sm:$0xff]  ;;  %v459_v63 = vld [vmem:[#allocation7 + $0x248] sm:$0xff] }
  0x44   :  { %770 = vmatprep.subr.mxu1 %v1037_v0  ;;  %799 = vmatprep.subr.mxu0 %v1037_v0  ;;  %v458_v1 = vld [vmem:[#allocation7 + $0x240] sm:$0xff]  ;;  %v457_v2 = vld [vmem:[#allocation7 + $0x238] sm:$0xff]  ;;  %v456_v3 = vld [vmem:[#allocation7 + $0x230] sm:$0xff] }
  0x45   :  { %771 = vmatpush3.msra.mxu1 %v165_v11  ;;  %800 = vmatpush3.msra.mxu0 %v266_v24  ;;  %v455_v4 = vld [vmem:[#allocation7 + $0x228] sm:$0xff]  ;;  %v454_v5 = vld [vmem:[#allocation7 + $0x220] sm:$0xff]  ;;  %v453_v6 = vld [vmem:[#allocation7 + $0x218] sm:$0xff] }
  0x46   :  { %772 = vmatprep.subr.mxu1 %v1037_v0  ;;  %801 = vmatprep.subr.mxu0 %v1037_v0  ;;  %v349_v7 = vld [vmem:[#allocation5] sm:$0xff]  ;;  %v558_v20 = vld [vmem:[#allocation7 + $0x2d0] sm:$0xff]  ;;  %v557_v21 = vld [vmem:[#allocation7 + $0x2c8] sm:$0xff] }
  0x47   :  { %773 = vmatpush3.msra.mxu1 %v164_v12  ;;  %802 = vmatpush3.msra.mxu0 %v265_v25  ;;  %v452_v12 = vld [vmem:[#allocation7 + $0x210] sm:$0xff]  ;;  %v556_v22 = vld [vmem:[#allocation7 + $0x2c0] sm:$0xff]  ;;  %v555_v23 = vld [vmem:[#allocation7 + $0x2b8] sm:$0xff] }
  0x48   :  { %774 = vmatprep.subr.mxu1 %v1037_v0  ;;  %803 = vmatprep.subr.mxu0 %v1037_v0  ;;  %v554_v24 = vld [vmem:[#allocation7 + $0x2b0] sm:$0xff]  ;;  %v553_v25 = vld [vmem:[#allocation7 + $0x2a8] sm:$0xff] }
  0x49   :  { %775 = vmatpush3.msra.mxu1 %v163_v13  ;;  %804 = vmatpush3.msra.mxu0 %v264_v26  ;;  %v451_v13 = vld [vmem:[#allocation7 + $0x208] sm:$0xff]  ;;  %v552_v26 = vld [vmem:[#allocation7 + $0x2a0] sm:$0xff] }
  0x4a   :  { %776 = vmatprep.subr.mxu1 %v1037_v0  ;;  %805 = vmatprep.subr.mxu0 %v1037_v0 }
  0x4b   :  { %777 = vmatpush3.msra.mxu1 %v162_v14  ;;  %806 = vmatpush3.msra.mxu0 %v263_v27  ;;  %v450_v14 = vld [vmem:[#allocation7 + $0x200] sm:$0xff]  ;;  %v551_v27 = vld [vmem:[#allocation7 + $0x298] sm:$0xff] }
  0x4c   :  { %778 = vmatprep.subr.mxu1 %v1037_v0  ;;  %807 = vmatprep.subr.mxu0 %v1037_v0 }
  0x4d   :  { %779 = vmatpush3.msra.mxu1 %v161_v15  ;;  %808 = vmatpush3.msra.mxu0 %v262_v28  ;;  %v563_v15 = vld [vmem:[#allocation7 + $0x2f8] sm:$0xff]  ;;  %v671_v28 = vld [vmem:[#allocation8 + $0x3] ss:$0 sm:$0xff] }
  0x4e   :  { %780 = vmatprep.subr.mxu1 %v1037_v0  ;;  %809 = vmatprep.subr.mxu0 %v1037_v0 }
  0x4f   :  { %781 = vmatpush3.msra.mxu1 %v160_v16  ;;  %810 = vmatpush3.msra.mxu0 %v261_v29  ;;  %v562_v16 = vld [vmem:[#allocation7 + $0x2f0] sm:$0xff] }
  0x50   :  { %782 = vmatprep.subr.mxu1 %v1037_v0  ;;  %811 = vmatprep.subr.mxu0 %v1037_v0 }
  0x51   :  { %783 = vmatpush3.msra.mxu1 %v159_v17  ;;  %812 = vmatpush3.msra.mxu0 %v260_v30  ;;  %v561_v17 = vld [vmem:[#allocation7 + $0x2e8] sm:$0xff] }
  0x52   :  { %784 = vmatprep.subr.mxu1 %v1037_v0  ;;  %813 = vmatprep.subr.mxu0 %v1037_v0 }
  0x53   :  { %785 = vmatpush3.msra.mxu1 %v158_v18  ;;  %814 = vmatpush3.msra.mxu0 %v259_v31  ;;  %v560_v18 = vld [vmem:[#allocation7 + $0x2e0] sm:$0xff] }
  0x54   :  { %786 = vmatprep.subr.mxu1 %v1037_v0  ;;  %815 = vmatprep.subr.mxu0 %v1037_v0 }
  0x55   :  { %787 = vmatpush3.msra.mxu1 %v157_v19  ;;  %816 = vmatpush3.msra.mxu0 %v258_v32  ;;  %v559_v19 = vld [vmem:[#allocation7 + $0x2d8] sm:$0xff] }
  0x56   :  { %826 = vmatprep.subr.mxu1 %v1037_v0  ;;  %817 = vmatprep.subr.mxu0 %v1037_v0 }
  0x57   :  { %818 = vmatpush3.msra.mxu0 %v257_v39 }
  0x58   :  { %819 = vmatprep.subr.mxu0 %v1037_v0 }
  0x59   :  { %820 = vmatpush3.msra.mxu0 %v256_v40 }
  0x5a   :  { %821 = vmatprep.subr.mxu0 %v1037_v0 }
  0x5b   :  { %822 = vmatpush3.msra.mxu0 %v255_v41 }
  0x5c   :  { %833 = vmatprep.subr.mxu0 %v1037_v0 }
  0xfa   :  { %v149_v34 = vpop.f32.mrf.mxu0 }
  0xfb   :  { %v150_v35 = vadd.f32 %v666_v33, %v149_v34  ;;  %v550_v34 = vld [vmem:[#allocation7 + $0x290] sm:$0xff] }
  0xfc   :  { %v755_v36 = vpop.f32.mrf.mxu0 }
  0xfd   :  { %v154_v37 = vmul.f32 0.2, %v150_v35  ;;  %vm153_vm2 = vcmp.ge.f32.partialorder %v150_v35, 0.0  ;;  %v548_v36 = vld [vmem:[#allocation7 + $0x280] sm:$0xff] }
  0xff   :  { %v155_v38 = vsel %vm153_vm2, %v150_v35, %v154_v37  ;;  %v549_v35 = vld [vmem:[#allocation7 + $0x288] sm:$0xff]  ;;  %v673_v37 = vld [vmem:[#allocation8 + $0x4] ss:$0 sm:$0xff] }
 0x100   :  { %789 = vmatmul.mubr.f32.vlgmr.msra.gmra.mxu1 %v155_v38 }
 0x101   :  { %830 = vmatprep.mubr.msk.f32.mxu1 %vm1038_vm0, %v1037_v0  ;;  %827 = vmatpush3.msra.mxu1 %v364_v54 }
 0x102   :  { %828 = vmatprep.subr.mxu1 %v1037_v0 }
 0x103   :  { %829 = vmatpush3.msra.mxu1 %v363_v55 }
 0x104   :  { %868 = vmatprep.subr.mxu1 %v1037_v0 }
 0x1c0   :  { %v247_v43 = vpop.f32.mrf.mxu1 }
 0x1c1   :  { %v248_v44 = vadd.f32 %v668_v42, %v247_v43  ;;  %v674_v43 = vld [vmem:[#allocation8 + $0x5] ss:$0 sm:$0xff] }
 0x1c2   :  { %v790_v45 = vpop.f32.mrf.mxu1 }
 0x1c3   :  { %vm251_vm3 = vcmp.ge.f32.partialorder %v248_v44, 0.0  ;;  %v252_v46 = vmul.f32 0.2, %v248_v44 }
 0x1c5   :  { %v253_v47 = vsel %vm251_vm3, %v248_v44, %v252_v46 }
 0x1c6   :  { %824 = vmatmul.mubr.f32.vlgmr.msra.gmra.mxu0 %v253_v47 }
 0x1c7   :  { %865 = vmatprep.mubr.msk.f32.mxu0 %vm1038_vm0, %v1037_v0  ;;  %834 = vmatpush3.msra.mxu0 %v465_v56 }
 0x1c8   :  { %835 = vmatprep.subr.mxu0 %v1037_v0 }
 0x1c9   :  { %836 = vmatpush3.msra.mxu0 %v464_v57 }
 0x1ca   :  { %837 = vmatprep.subr.mxu0 %v1037_v0 }
 0x1cb   :  { %838 = vmatpush3.msra.mxu0 %v463_v58 }
 0x1cc   :  { %839 = vmatprep.subr.mxu0 %v1037_v0 }
 0x1cd   :  { %840 = vmatpush3.msra.mxu0 %v462_v59 }
 0x1ce   :  { %841 = vmatprep.subr.mxu0 %v1037_v0 }
 0x1cf   :  { %842 = vmatpush3.msra.mxu0 %v461_v61 }
 0x1d0   :  { %843 = vmatprep.subr.mxu0 %v1037_v0 }
 0x1d1   :  { %844 = vmatpush3.msra.mxu0 %v460_v62 }
 0x1d2   :  { %845 = vmatprep.subr.mxu0 %v1037_v0 }
 0x1d3   :  { %846 = vmatpush3.msra.mxu0 %v459_v63 }
 0x1d4   :  { %847 = vmatprep.subr.mxu0 %v1037_v0 }
 0x1d5   :  { %848 = vmatpush3.msra.mxu0 %v458_v1 }
 0x1d6   :  { %849 = vmatprep.subr.mxu0 %v1037_v0 }
 0x1d7   :  { %850 = vmatpush3.msra.mxu0 %v457_v2 }
 0x1d8   :  { %851 = vmatprep.subr.mxu0 %v1037_v0 }
 0x1d9   :  { %852 = vmatpush3.msra.mxu0 %v456_v3 }
 0x1da   :  { %853 = vmatprep.subr.mxu0 %v1037_v0 }
 0x1db   :  { %854 = vmatpush3.msra.mxu0 %v455_v4 }
 0x1dc   :  { %855 = vmatprep.subr.mxu0 %v1037_v0 }
 0x1dd   :  { %856 = vmatpush3.msra.mxu0 %v454_v5 }
 0x1de   :  { %857 = vmatprep.subr.mxu0 %v1037_v0 }
 0x1df   :  { %858 = vmatpush3.msra.mxu0 %v453_v6 }
 0x1e0   :  { %859 = vmatprep.subr.mxu0 %v1037_v0 }
 0x1e1   :  { %860 = vmatpush3.msra.mxu0 %v452_v12 }
 0x1e2   :  { %861 = vmatprep.subr.mxu0 %v1037_v0 }
 0x1e3   :  { %862 = vmatpush3.msra.mxu0 %v451_v13 }
 0x1e4   :  { %863 = vmatprep.subr.mxu0 %v1037_v0 }
 0x1e5   :  { %864 = vmatpush3.msra.mxu0 %v450_v14 }
 0x286   :  { %v345_v49 = vpop.f32.mrf.mxu0 }
 0x287   :  { %v346_v50 = vadd.f32 %v669_v48, %v345_v49 }
 0x288   :  { %v825_v51 = vpop.f32.mrf.mxu0 }
 0x289   :  { %v350_v52 = vmul.f32 0.5, %v346_v50  ;;  %648 = vst [vmem:[#allocation10 + $0x8] sm:$0xff] %v346_v50 }
 0x28b   :  { %v351_v53 = vmul.f32 1.442695, %v350_v52 }
 0x28d   :  { %915 = vpow2.f32 %v351_v53 }
 0x29a   :  { %v916_v60 = vpop.eup %915 }
 0x29b   :  { %354 = vrot.lane.b32.xlu0 %v916_v60, %s1039_s2 }
 0x30d   :  { %v355_v8 = vpop.permute.xlu0 %354 }
 0x30e   :  { %v357_v9 = vmul.f32 %v355_v8, %v349_v7 }
 0x310   :  { %v358_v10 = vadd.f32 %v357_v9, %v346_v50 }
 0x312   :  { %vm359_vm4 = vcmp.gt.f32.partialorder %v358_v10, 0.0 }
 0x313   :  { %v670_v11 = vsel %vm359_vm4, 1.0, %v1037_v0 }
 0x314   :  { %831 = vmatmul.mubr.msk.f32.vlgmr.msra.gmra.mxu1 %vm79_vm1, %v670_v11 }
 0x315   :  { %900 = vmatprep.mubr.msk.f32.mxu1 %vm1038_vm0, %v1037_v0  ;;  %869 = vmatpush3.msra.mxu1 %v563_v15 }
 0x316   :  { %870 = vmatprep.subr.mxu1 %v1037_v0 }
 0x317   :  { %871 = vmatpush3.msra.mxu1 %v562_v16 }
 0x318   :  { %872 = vmatprep.subr.mxu1 %v1037_v0 }
 0x319   :  { %873 = vmatpush3.msra.mxu1 %v561_v17 }
 0x31a   :  { %874 = vmatprep.subr.mxu1 %v1037_v0 }
 0x31b   :  { %875 = vmatpush3.msra.mxu1 %v560_v18 }
 0x31c   :  { %876 = vmatprep.subr.mxu1 %v1037_v0 }
 0x31d   :  { %877 = vmatpush3.msra.mxu1 %v559_v19 }
 0x31e   :  { %878 = vmatprep.subr.mxu1 %v1037_v0 }
 0x31f   :  { %879 = vmatpush3.msra.mxu1 %v558_v20 }
 0x320   :  { %880 = vmatprep.subr.mxu1 %v1037_v0 }
 0x321   :  { %881 = vmatpush3.msra.mxu1 %v557_v21 }
 0x322   :  { %882 = vmatprep.subr.mxu1 %v1037_v0 }
 0x323   :  { %883 = vmatpush3.msra.mxu1 %v556_v22 }
 0x324   :  { %884 = vmatprep.subr.mxu1 %v1037_v0 }
 0x325   :  { %885 = vmatpush3.msra.mxu1 %v555_v23 }
 0x326   :  { %886 = vmatprep.subr.mxu1 %v1037_v0 }
 0x327   :  { %887 = vmatpush3.msra.mxu1 %v554_v24 }
 0x328   :  { %888 = vmatprep.subr.mxu1 %v1037_v0 }
 0x329   :  { %889 = vmatpush3.msra.mxu1 %v553_v25 }
 0x32a   :  { %890 = vmatprep.subr.mxu1 %v1037_v0 }
 0x32b   :  { %891 = vmatpush3.msra.mxu1 %v552_v26 }
 0x32c   :  { %892 = vmatprep.subr.mxu1 %v1037_v0 }
 0x32d   :  { %893 = vmatpush3.msra.mxu1 %v551_v27 }
 0x32e   :  { %894 = vmatprep.subr.mxu1 %v1037_v0 }
 0x32f   :  { %895 = vmatpush3.msra.mxu1 %v550_v34 }
 0x330   :  { %896 = vmatprep.subr.mxu1 %v1037_v0 }
 0x331   :  { %897 = vmatpush3.msra.mxu1 %v549_v35 }
 0x332   :  { %898 = vmatprep.subr.mxu1 %v1037_v0 }
 0x333   :  { %899 = vmatpush3.msra.mxu1 %v548_v36 }
 0x3d4   :  { %v442_v29 = vpop.f32.mrf.mxu1 }
 0x3d5   :  { %v443_v30 = vadd.f32 %v671_v28, %v442_v29 }
 0x3d6   :  { %v832_v31 = vpop.f32.mrf.mxu1 }
 0x3d7   :  { %vm446_vm5 = vcmp.ge.f32.partialorder %v443_v30, 0.0  ;;  %v447_v32 = vmul.f32 0.2, %v443_v30 }
 0x3d9   :  { %v448_v33 = vsel %vm446_vm5, %v443_v30, %v447_v32 }
 0x3da   :  { %866 = vmatmul.mubr.f32.vlgmr.msra.gmra.mxu0 %v448_v33 }
 0x49a   :  { %v540_v38 = vpop.f32.mrf.mxu0 }
 0x49b   :  { %v541_v39 = vadd.f32 %v673_v37, %v540_v38 }
 0x49c   :  { %v867_v40 = vpop.f32.mrf.mxu0 }
 0x49d   :  { %vm544_vm6 = vcmp.ge.f32.partialorder %v541_v39, 0.0  ;;  %v545_v41 = vmul.f32 0.2, %v541_v39 }
 0x49f   :  { %v546_v42 = vsel %vm544_vm6, %v541_v39, %v545_v41 }
 0x4a0   :  { %901 = vmatmul.mubr.f32.vlgmr.msra.gmra.mxu1 %v546_v42 }
 0x560   :  { %v638_v44 = vpop.f32.mrf.mxu1 }
 0x561   :  { %v639_v45 = vadd.f32 %v674_v43, %v638_v44 }
 0x562   :  { %v902_v46 = vpop.f32.mrf.mxu1 }
 0x563   :  { %v642_v47 = vsub.f32 0.0, %v639_v45 }
 0x565   :  { %v643_v48 = vmul.f32 1.442695, %v642_v47 }
 0x567   :  { %917 = vpow2.f32 %v643_v48 }
 0x574   :  { %v918_v49 = vpop.eup %917 }
 0x575   :  { %v645_v50 = vadd.f32 1.0, %v918_v49 }
 0x577   :  { %919 = vrcp.f32 %v645_v50 }
 0x584   :  { %v920_v0 = vpop.eup %919 }
 0x585   :  { %647 = vst [vmem:[#allocation10] sm:$0xff] %v920_v0 }
 0x586   :  { %1012 = shalt.err (!%p1009_p10)
}
 0x587   :  { %658 = dma.vmem_to_hbm [thread:$0]  %s656_s11, 256, %s1168_s4, [#allocation4]  }
 0x588   :  { %1027 = dma.done.wait [#allocation4], 256  }
 0x589   :  { %1028 = vsyncadd [#allocation4], 4294967040 }
 0x58a   :  { %662 = vsyncpa [#allocation3], 1 }
 0x58b   :  { %663 = vsyncpa [#allocation6], 1 }
 0x58c   :  { %664 = vsyncpa [#allocation9], 1 }
 0x58d   :  { %665 = vsyncpa [#allocation4], 1 }

</bundles_post_ra>
